<compile_context>
chip_gen: v5e
topology: v5e:2x2
jax: 0.10.0
libtpu: 0.0.40
codegen_flags: <defaults>
</compile_context>

<pallas_src>
import functools

import jax
import jax.numpy as jnp
from jax.experimental import pallas as pl
from jax.experimental.pallas import tpu as pltpu


OMEGA = 30.0
_LANES = 128

# --- Cody-Waite split of pi (f32) -------------------------------------------
_INV_PI = 0.3183098861837907     # 1/pi
_PI_HI = 3.140625                # 8 significand bits -> n * _PI_HI is exact
_PI_MID = 9.67653589793e-4       # pi - _PI_HI

# Even polynomial in r (degree 12) for cos(r) on |r| <= pi/2.
# Truncation error < 7e-9; Horner rounding adds a few f32 ulps.
_COS_COEFFS = (
    1.0,
    -0.5,
    0.041666666666666664,        # 1/24
    -0.001388888888888889,       # -1/720
    2.48015873015873e-05,        # 1/40320
    -2.755731922398589e-07,      # -1/3628800
    2.08767569878681e-09,        # 1/479001600
)


def _round_up(x, m):
    return ((x + m - 1) // m) * m


def _fast_cos_times(x, omega):
    """cos(omega * x) for f32 `x`: Cody-Waite reduction mod pi + even poly.

    ~13 VALU ops + a floor/convert/select instead of jnp.cos's generic
    expansion.  Accuracy assumption (documented per review): |omega*x| well
    below 2**24 so the f32 quotient/parity stay exact -- always true for
    SIREN activations.  The explicit `omega * x` multiply is kept (rather
    than folding omega into _INV_PI) so the reduced argument tracks
    jnp.cos(omega*x) to a few ulps; it costs a single VPU op.
    """
    y = omega * x
    q = y * _INV_PI
    n = jnp.floor(q + 0.5)                    # nearest integer multiple of pi
    r = (y - n * _PI_HI) - n * _PI_MID        # |r| <= pi/2 (+ tiny slop)
    u = r * r
    p = _COS_COEFFS[-1]
    for c in _COS_COEFFS[-2::-1]:             # Horner, unrolled at trace time
        p = p * u + c
    ni = n.astype(jnp.int32)
    return jnp.where((ni & 1) == 0, p, -p)    # cos(n*pi + r) = (-1)^n cos(r)


def _cosine_kernel(x_ref, o_ref, *, omega):
    x = x_ref[...]
    if x.dtype != jnp.float32:
        # Upcast once: keeps the range reduction in f32 (accuracy) and avoids
        # per-op narrow-dtype casts on v5e (no bf16 VPU there).
        x = x.astype(jnp.float32)
    o_ref[...] = _fast_cos_times(x, omega).astype(o_ref.dtype)


def _vmem_capacity_bytes(default=64 << 20):
    # Conservative default (v7x per-TC VMEM) if introspection is unavailable,
    # so a detection failure can never over-commit VMEM.
    try:
        return int(getattr(pltpu.get_tpu_info(), "vmem_capacity_bytes", default))
    except Exception:  # pragma: no cover - depends on runtime/backend
        return default


def _cosine_2d(x2d, out_dtype, omega):
    """Elementwise kernel over a lane-dense (rows, 128) slab."""
    n_rows = x2d.shape[0]
    in_item = jnp.dtype(x2d.dtype).itemsize
    out_item = jnp.dtype(out_dtype).itemsize
    # Sublane packing of the narrowest buffer: 8 (32-bit), 16 (bf16), 32 (8-bit).
    sublane = max(8, 32 // min(in_item, out_item))
    row_bytes = _LANES * max(in_item, out_item)

    # Generation-aware block sizing:
    #  * small-VMEM parts (v7x: 64 MiB/TC, 2 TCs): 8 MiB blocks, 40 MiB limit,
    #    force >=4 grid steps on mid-size slabs so each TC double-buffers.
    #  * 128 MiB-VMEM parts (v5e/v6e, 1 TC): 16 MiB blocks, 72 MiB limit,
    #    force >=2 steps only (no benefit in more on a single core).
    small_vmem = _vmem_capacity_bytes() <= (96 << 20)
    target_block_bytes = (8 << 20) if small_vmem else (16 << 20)
    min_steps = 4 if small_vmem else 2
    vmem_limit = 4 * target_block_bytes + (8 << 20)  # 2x-buffered in+out + headroom

    row_tile = max(sublane, (target_block_bytes // row_bytes) // sublane * sublane)
    row_tile = min(row_tile, _round_up(n_rows, sublane))

    slab_bytes = n_rows * row_bytes
    if pl.cdiv(n_rows, row_tile) < min_steps and slab_bytes >= (2 << 20):
        row_tile = max(sublane, _round_up(pl.cdiv(n_rows, min_steps), sublane))

    grid = (pl.cdiv(n_rows, row_tile),)
    total = n_rows * _LANES
    cost = pl.CostEstimate(
        flops=26 * total,            # reduction + degree-12 even polynomial
        transcendentals=0,           # no EUP ops used
        bytes_accessed=total * (in_item + out_item),
    )

    return pl.pallas_call(
        functools.partial(_cosine_kernel, omega=omega),
        out_shape=jax.ShapeDtypeStruct((n_rows, _LANES), out_dtype),
        grid=grid,
        in_specs=[pl.BlockSpec((row_tile, _LANES), lambda i: (i, 0))],
        out_specs=pl.BlockSpec((row_tile, _LANES), lambda i: (i, 0)),
        compiler_params=pltpu.CompilerParams(
            dimension_semantics=("parallel",),
            vmem_limit_bytes=vmem_limit,
        ),
        cost_estimate=cost,
    )(x2d)


def cosine(x, omega=OMEGA):
    """cos(omega * x), elementwise, any shape.

    Floating dtypes are preserved; integer inputs are promoted to float32
    output (cos values in [-1, 1] cannot live in an int dtype).
    """
    orig_shape = x.shape
    in_dtype = x.dtype
    out_dtype = in_dtype if jnp.issubdtype(in_dtype, jnp.floating) else jnp.float32
    total = x.size
    omega = float(omega)

    if total == 0:
        return x.astype(out_dtype)

    x_flat = x.reshape(-1)
    n_rows = total // _LANES
    rem = total - n_rows * _LANES

    if n_rows == 0:
        # Fewer than 128 elements: not worth a kernel launch.
        y = jnp.cos(omega * x_flat.astype(jnp.float32)).astype(out_dtype)
        return y.reshape(orig_shape)

    aligned = n_rows * _LANES
    body = x_flat[:aligned].reshape(n_rows, _LANES)
    out_body = _cosine_2d(body, out_dtype, omega)

    if rem == 0:
        # Aligned fast path: pure metadata reshape, no extra HBM pass.
        return out_body.reshape(orig_shape)

    # Ragged tail (< 128 elements): compute it directly instead of padding and
    # re-slicing the whole array (which cost ~3x HBM traffic previously).
    tail = x_flat[aligned:]
    out_tail = jnp.cos(omega * tail.astype(jnp.float32)).astype(out_dtype)
    return jnp.concatenate([out_body.reshape(-1), out_tail]).reshape(orig_shape)


if __name__ == "__main__":
    key = jax.random.PRNGKey(0)
    k0, k1, k2, k3 = jax.random.split(key, 4)

    # Small NCHW-style feature map (SIREN activation input), f32.
    x = jax.random.normal(k0, (2, 4, 16, 16), dtype=jnp.float32)
    y = jax.block_until_ready(cosine(x, OMEGA))
    y_ref = jnp.cos(OMEGA * x)
    assert y.shape == x.shape and y.dtype == x.dtype
    assert jnp.allclose(y, y_ref, atol=2e-5, rtol=1e-5)

    # Larger aligned slab: exercises the big-block, multi-step grid path.
    x2 = jax.random.normal(k1, (4, 64, 64, 64), dtype=jnp.float32)
    y2 = jax.block_until_ready(cosine(x2, OMEGA))
    assert jnp.allclose(y2, jnp.cos(OMEGA * x2), atol=1e-4, rtol=1e-4)

    # bf16 path: upcast-to-f32 reduction inside the kernel, bf16 stored back.
    x3 = jax.random.normal(k2, (2, 8, 32), dtype=jnp.bfloat16)
    y3 = jax.block_until_ready(cosine(x3, OMEGA))
    y3_ref = jnp.cos(OMEGA * x3.astype(jnp.float32)).astype(jnp.bfloat16)
    assert y3.dtype == jnp.bfloat16
    assert jnp.allclose(y3.astype(jnp.float32), y3_ref.astype(jnp.float32), atol=2e-2)

    # Ragged element count (not a multiple of 128): prefix kernel + tiny tail.
    x4 = jax.random.normal(k3, (5, 131), dtype=jnp.float32)
    y4 = jax.block_until_ready(cosine(x4, OMEGA))
    assert jnp.allclose(y4, jnp.cos(OMEGA * x4), atol=2e-5, rtol=1e-5)

    print("KERNEL_OK")
</pallas_src>

<mosaic_0001>
module attributes {stable_mosaic.version = 11 : i64} {
  func.func @_cosine_kernel(%arg0: i32, %arg1: memref<16x128xf32, #tpu.memory_space<vmem>>, %arg2: memref<16x128xf32, #tpu.memory_space<vmem>>) attributes {dimension_semantics = [#tpu.dimension_semantics<parallel>], iteration_bounds = array<i64: 1>, scalar_prefetch = 0 : i64, scratch_operands = 0 : i64, tpu.core_type = #tpu.core_type<tc>, window_params = [{transform_indices = @transform_0, window_bounds = array<i64: 16, 128>}, {transform_indices = @transform_1, window_bounds = array<i64: 16, 128>}]} {
    %c0 = arith.constant 0 : index
    %c0_0 = arith.constant 0 : index
    %0 = vector.load %arg1[%c0, %c0_0] : memref<16x128xf32, #tpu.memory_space<vmem>>, vector<16x128xf32>
    %cst = arith.constant 3.000000e+01 : f32
    %1 = vector.broadcast %cst : f32 to vector<16x128xf32>
    %2 = arith.mulf %1, %0 : vector<16x128xf32>
    %cst_1 = arith.constant 0.318309873 : f32
    %3 = vector.broadcast %cst_1 : f32 to vector<16x128xf32>
    %4 = arith.mulf %2, %3 : vector<16x128xf32>
    %cst_2 = arith.constant 5.000000e-01 : f32
    %5 = vector.broadcast %cst_2 : f32 to vector<16x128xf32>
    %6 = arith.addf %4, %5 : vector<16x128xf32>
    %7 = math.floor %6 : vector<16x128xf32>
    %cst_3 = arith.constant 3.140625 : f32
    %8 = vector.broadcast %cst_3 : f32 to vector<16x128xf32>
    %9 = arith.mulf %7, %8 : vector<16x128xf32>
    %10 = arith.subf %2, %9 : vector<16x128xf32>
    %cst_4 = arith.constant 9.67653584E-4 : f32
    %11 = vector.broadcast %cst_4 : f32 to vector<16x128xf32>
    %12 = arith.mulf %7, %11 : vector<16x128xf32>
    %13 = arith.subf %10, %12 : vector<16x128xf32>
    %14 = arith.mulf %13, %13 : vector<16x128xf32>
    %cst_5 = arith.constant 2.08767559E-9 : f32
    %15 = vector.broadcast %cst_5 : f32 to vector<16x128xf32>
    %16 = arith.mulf %15, %14 : vector<16x128xf32>
    %cst_6 = arith.constant -2.755732E-7 : f32
    %17 = vector.broadcast %cst_6 : f32 to vector<16x128xf32>
    %18 = arith.addf %16, %17 : vector<16x128xf32>
    %19 = arith.mulf %18, %14 : vector<16x128xf32>
    %cst_7 = arith.constant 2.48015876E-5 : f32
    %20 = vector.broadcast %cst_7 : f32 to vector<16x128xf32>
    %21 = arith.addf %19, %20 : vector<16x128xf32>
    %22 = arith.mulf %21, %14 : vector<16x128xf32>
    %cst_8 = arith.constant -0.00138888892 : f32
    %23 = vector.broadcast %cst_8 : f32 to vector<16x128xf32>
    %24 = arith.addf %22, %23 : vector<16x128xf32>
    %25 = arith.mulf %24, %14 : vector<16x128xf32>
    %cst_9 = arith.constant 0.0416666679 : f32
    %26 = vector.broadcast %cst_9 : f32 to vector<16x128xf32>
    %27 = arith.addf %25, %26 : vector<16x128xf32>
    %28 = arith.mulf %27, %14 : vector<16x128xf32>
    %cst_10 = arith.constant -5.000000e-01 : f32
    %29 = vector.broadcast %cst_10 : f32 to vector<16x128xf32>
    %30 = arith.addf %28, %29 : vector<16x128xf32>
    %31 = arith.mulf %30, %14 : vector<16x128xf32>
    %cst_11 = arith.constant 1.000000e+00 : f32
    %32 = vector.broadcast %cst_11 : f32 to vector<16x128xf32>
    %33 = arith.addf %31, %32 : vector<16x128xf32>
    %34 = arith.fptosi %7 : vector<16x128xf32> to vector<16x128xi32>
    %c1_i32 = arith.constant 1 : i32
    %35 = vector.broadcast %c1_i32 : i32 to vector<16x128xi32>
    %36 = arith.andi %34, %35 : vector<16x128xi32>
    %c0_i32 = arith.constant 0 : i32
    %37 = vector.broadcast %c0_i32 : i32 to vector<16x128xi32>
    %38 = arith.cmpi eq, %36, %37 : vector<16x128xi32>
    %cst_12 = arith.constant 0.000000e+00 : f32
    %39 = vector.broadcast %cst_12 : f32 to vector<16x128xf32>
    %40 = arith.subf %39, %33 : vector<16x128xf32>
    %41 = arith.select %38, %33, %40 : vector<16x128xi1>, vector<16x128xf32>
    %c0_13 = arith.constant 0 : index
    %c0_14 = arith.constant 0 : index
    %42 = vector.load %arg2[%c0_13, %c0_14] : memref<16x128xf32, #tpu.memory_space<vmem>>, vector<16x128xf32>
    tpu.vector_store %arg2[%c0_13, %c0_14], %41 {strides = array<i32>} : memref<16x128xf32, #tpu.memory_space<vmem>>, vector<16x128xf32>,
    return
  }
  func.func @transform_0(%arg0: i32) -> (i32, i32) {
    %c0_i32 = arith.constant 0 : i32
    %c0_i32_0 = arith.constant 0 : i32
    return %arg0, %c0_i32 : i32, i32
  }
  func.func @transform_1(%arg0: i32) -> (i32, i32) {
    %c0_i32 = arith.constant 0 : i32
    %c0_i32_0 = arith.constant 0 : i32
    return %arg0, %c0_i32 : i32, i32
  }
}

</mosaic_0001>

<bundles_post_ra>
// kernel: tpu_custom_call.1
= control target key start
LH: loop header
LB: loop body
LE: loop exit
PB: predicated region body
PF: predicated region fallthrough
CT: control target
= control target key end

     0   :  { %6 = vsyncpa [#allocation3], 0  ;;  %s186_s0 = inlined_call_operand.hbm [shape: f32[16,128], index: 0, kind: input, shape index: {}]   ;;  %s187_s1 = inlined_call_operand.hbm [shape: f32[16,128], index: 1, kind: output, shape index: {}]  }
   0x1   :  { %7 = vsyncpa [#allocation4], 0  ;;  %s12_s8 = sshll.u32 %s186_s0, 4  ;;  %s160_s9 = smov [#allocation2]   ;;  %s13_s8 = int_to_ptr.hbm [resolvable:$true] %s12_s8 }
   0x2   :  { %s14_s10 = sshll.u32 %s160_s9, 4  ;;  %s161_s11 = smov 128   ;;  %s15_s10 = int_to_ptr.vmem [resolvable:$true] %s14_s10 }
   0x3   :  { %s162_s12 = smov 8  }
   0x4   :  { %20 = dma.hbm_to_vmem [thread:$0]  %s13_s8, 256, %s15_s10, [#allocation3], %s161_s11, %s161_s11, %s162_s12  }
   0x5   :  { %156 = dma.done.wait [#allocation3], 256  }
   0x6   :  { %157 = vsyncadd [#allocation3], 4294967040  ;;  %v25_v0 = vld [vmem:[#allocation2] sm:$0xff]  ;;  %v26_v1 = vld [vmem:[#allocation2 + $0x8] sm:$0xff]  ;;  %s163_s0 = smov [#allocation5]   ;;  %s87_s16 = sshll.u32 %s187_s1, 4  ;;  %s88_s16 = int_to_ptr.hbm [resolvable:$true] %s87_s16 }
   0x7   :  { %v27_v2 = vmul.f32 30.0, %v25_v0  ;;  %v28_v3 = vmul.f32 30.0, %v26_v1  ;;  %s85_s13 = sshll.u32 %s163_s0, 4  ;;  %s86_s13 = int_to_ptr.vmem [resolvable:$true] %s85_s13 }
   0x9   :  { %v29_v4 = vmul.f32 0.31830987, %v27_v2  ;;  %v30_v5 = vmul.f32 0.31830987, %v28_v3 }
   0xb   :  { %v31_v6 = vadd.f32 0.5, %v29_v4  ;;  %v32_v7 = vadd.f32 0.5, %v30_v5 }
   0xd   :  { %v33_v8 = vfloor.f32 %v31_v6  ;;  %v34_v9 = vfloor.f32 %v32_v7 }
   0xf   :  { %v35_v10 = vmul.f32 3.140625, %v33_v8  ;;  %v39_v11 = vmul.f32 0.0009676536, %v33_v8  ;;  %v36_v12 = vmul.f32 3.140625, %v34_v9  ;;  %v40_v13 = vmul.f32 0.0009676536, %v34_v9 }
  0x10   :  { %v101_v36 = vcvt.f32.s32 %v33_v8  ;;  %v103_v37 = vcvt.f32.s32 %v34_v9 }
  0x11   :  { %v37_v14 = vsub.f32 %v27_v2, %v35_v10  ;;  %v38_v15 = vsub.f32 %v28_v3, %v36_v12 }
  0x12   :  { %v71_v42 = vand.u32 1, %v101_v36  ;;  %v72_v43 = vand.u32 1, %v103_v37 }
  0x13   :  { %v41_v16 = vsub.f32 %v37_v14, %v39_v11  ;;  %v42_v17 = vsub.f32 %v38_v15, %v40_v13 }
  0x14   :  { %vm73_vm0 = vcmp.eq.s32.totalorder %v71_v42, 0  ;;  %vm74_vm1 = vcmp.eq.s32.totalorder %v72_v43, 0 }
  0x15   :  { %v43_v18 = vmul.f32 %v41_v16, %v41_v16  ;;  %v44_v19 = vmul.f32 %v42_v17, %v42_v17 }
  0x17   :  { %v45_v20 = vmul.f32 2.0876756e-09, %v43_v18  ;;  %v46_v21 = vmul.f32 2.0876756e-09, %v44_v19 }
  0x19   :  { %v47_v22 = vadd.f32 -2.755732e-07, %v45_v20  ;;  %v48_v23 = vadd.f32 -2.755732e-07, %v46_v21 }
  0x1b   :  { %v49_v24 = vmul.f32 %v47_v22, %v43_v18  ;;  %v50_v25 = vmul.f32 %v48_v23, %v44_v19 }
  0x1d   :  { %v51_v26 = vadd.f32 2.4801588e-05, %v49_v24  ;;  %v52_v27 = vadd.f32 2.4801588e-05, %v50_v25 }
  0x1f   :  { %v53_v28 = vmul.f32 %v51_v26, %v43_v18  ;;  %v54_v29 = vmul.f32 %v52_v27, %v44_v19 }
  0x21   :  { %v55_v30 = vadd.f32 -0.0013888889, %v53_v28  ;;  %v56_v31 = vadd.f32 -0.0013888889, %v54_v29 }
  0x23   :  { %v57_v32 = vmul.f32 %v55_v30, %v43_v18  ;;  %v58_v33 = vmul.f32 %v56_v31, %v44_v19 }
  0x25   :  { %v59_v34 = vadd.f32 0.041666668, %v57_v32  ;;  %v60_v35 = vadd.f32 0.041666668, %v58_v33 }
  0x27   :  { %v61_v38 = vmul.f32 %v59_v34, %v43_v18  ;;  %v62_v39 = vmul.f32 %v60_v35, %v44_v19 }
  0x29   :  { %v63_v40 = vadd.f32 -0.5, %v61_v38  ;;  %v64_v41 = vadd.f32 -0.5, %v62_v39 }
  0x2b   :  { %v65_v44 = vmul.f32 %v63_v40, %v43_v18  ;;  %v66_v45 = vmul.f32 %v64_v41, %v44_v19 }
  0x2d   :  { %v67_v46 = vadd.f32 1.0, %v65_v44  ;;  %v68_v47 = vadd.f32 1.0, %v66_v45 }
  0x2f   :  { %v75_v48 = vsub.f32 0.0, %v67_v46  ;;  %v76_v49 = vsub.f32 0.0, %v68_v47 }
  0x31   :  { %v77_v50 = vsel %vm73_vm0, %v67_v46, %v75_v48  ;;  %v78_v51 = vsel %vm74_vm1, %v68_v47, %v76_v49 }
  0x32   :  { %79 = vst [vmem:[#allocation5] sm:$0xff] %v77_v50 }
  0x33   :  { %80 = vst [vmem:[#allocation5 + $0x8] sm:$0xff] %v78_v51 }
  0x34   :  { %93 = dma.vmem_to_hbm [thread:$0]  %s86_s13, 256, %s88_s16, [#allocation4], %s161_s11, %s161_s11, %s162_s12  }
  0x35   :  { %158 = dma.done.wait [#allocation4], 256  }
  0x36   :  { %159 = vsyncadd [#allocation4], 4294967040 }
  0x37   :  { %98 = vsyncpa [#allocation3], 1 }
  0x38   :  { %99 = vsyncpa [#allocation4], 1 }

</bundles_post_ra>
